<compile_context>
chip_gen: v5e
topology: v5e:2x2
jax: 0.10.0
libtpu: 0.0.40
codegen_flags: <defaults>
</compile_context>

<pallas_src>
import functools

import jax
import jax.numpy as jnp
from jax.experimental import pallas as pl
from jax.experimental.pallas import tpu as pltpu

_LANE = 128
_EPS = 1e-5


def _cdiv(a, b):
    return (a + b - 1) // b


def _round_up(a, m):
    return _cdiv(a, m) * m


def _biasfree_ln_kernel(x_ref, w_ref, o_ref, *, inv_c, eps):
    """One (C, T) tile: normalize every lane-column over the channel axis."""
    x = x_ref[...].astype(jnp.float32)            # (C, T)  channels x spatial
    w = w_ref[...].astype(jnp.float32)            # (C, 1)

    # Fused single pass over the tile: sum and sum-of-squares together.
    s1 = jnp.sum(x, axis=0, keepdims=True)        # (1, T)
    s2 = jnp.sum(x * x, axis=0, keepdims=True)    # (1, T)
    mu = s1 * inv_c
    var = s2 * inv_c - mu * mu                    # unbiased=False variance
    inv = jax.lax.rsqrt(var + eps)                # (1, T)

    # BiasFree: raw (un-centered) x scaled by rsqrt of the centered variance.
    o_ref[...] = (x * inv * w).astype(o_ref.dtype)


def _pick_tile_hw(hw, c, itemsize, requested, batch):
    """Choose the spatial (lane) tile: big for HBM roofline, but VMEM-safe."""
    tile = min(_round_up(requested, _LANE), _round_up(max(hw, 1), _LANE))
    # Keep the double-buffered (input + output) tiles under ~8 MiB so we stay
    # comfortably inside the default scoped-VMEM limit on v5e/v6e/v7x.
    vmem_budget = 8 * 1024 * 1024
    max_tile = max(_LANE, (vmem_budget // max(1, 4 * c * itemsize)) // _LANE * _LANE)
    tile = min(tile, max_tile)
    # Keep >= 4 grid steps so both TensorCores on v7x get work.
    while batch * _cdiv(hw, tile) < 4 and tile > _LANE:
        smaller = max(_LANE, (tile // 2) // _LANE * _LANE)
        if smaller == tile:
            break
        tile = smaller
    return tile


def _biasfree_ln_channels_first(x3, weight, *, eps=_EPS, tile_hw=2048,
                                donate_input=False):
    """x3: (B, C, N) -- BiasFree LayerNorm over the channel axis (axis=1)."""
    b, c, n = x3.shape
    tile = _pick_tile_hw(n, c, jnp.dtype(x3.dtype).itemsize, tile_hw, b)
    w2 = weight.reshape(c, 1)
    kernel = functools.partial(_biasfree_ln_kernel, inv_c=1.0 / c, eps=eps)
    return pl.pallas_call(
        kernel,
        out_shape=jax.ShapeDtypeStruct((b, c, n), x3.dtype),
        grid_spec=pltpu.PrefetchScalarGridSpec(
            num_scalar_prefetch=0,
            grid=(b, pl.cdiv(n, tile)),
            in_specs=[
                # batch dim squeezed out; channels on sublanes, spatial on lanes
                pl.BlockSpec((None, c, tile), lambda i, j: (i, 0, j)),
                pl.BlockSpec((c, 1), lambda i, j: (0, 0)),
            ],
            out_specs=pl.BlockSpec((None, c, tile), lambda i, j: (i, 0, j)),
        ),
        # Optional: alias x -> out (saves an HBM output allocation when the
        # caller no longer needs x). Off by default for safety in tests.
        input_output_aliases=({0: 0} if donate_input else {}),
        compiler_params=pltpu.CompilerParams(
            dimension_semantics=("parallel", "parallel")),
    )(x3, w2)


def biasfree_layernorm_nchw(x, weight, *, eps=_EPS, tile_hw=2048,
                            donate_input=False):
    """Restormer usage: NCHW input, BiasFree LayerNorm over the channel dim.

    Equivalent to to_4d(BiasFree_LayerNorm(to_3d(x)), h, w), but with zero
    wrapper transposes -- only free reshapes around the Pallas call.
    """
    b, c, h, w = x.shape
    y3 = _biasfree_ln_channels_first(x.reshape(b, c, h * w), weight, eps=eps,
                                     tile_hw=tile_hw, donate_input=donate_input)
    return y3.reshape(b, c, h, w)


def biasfree_layernorm(x, weight, *, eps=_EPS, tile_hw=2048):
    """Literal module API: x of shape (..., C), normalize the LAST dim.

    Inside the Restormer pipeline prefer biasfree_layernorm_nchw(), which
    avoids the two layout transposes this generic channel-last entry needs.
    """
    c = x.shape[-1]
    rows = x.size // c
    x3 = jnp.transpose(x.reshape(rows, c), (1, 0))[None]      # (1, C, rows)
    y3 = _biasfree_ln_channels_first(x3, weight, eps=eps, tile_hw=tile_hw)
    return jnp.transpose(y3[0], (1, 0)).reshape(x.shape)


# ----------------------------- references ----------------------------------


def _ref_last_dim(x, weight, eps=_EPS):
    xf = x.astype(jnp.float32)
    mu = jnp.mean(xf, axis=-1, keepdims=True)
    var = jnp.mean((xf - mu) ** 2, axis=-1, keepdims=True)
    y = xf / jnp.sqrt(var + eps) * weight.astype(jnp.float32)
    return y.astype(x.dtype)


def _ref_nchw(x, weight, eps=_EPS):
    b, c, h, w = x.shape
    x3 = jnp.transpose(x, (0, 2, 3, 1)).reshape(b, h * w, c)
    y3 = _ref_last_dim(x3, weight, eps)
    return jnp.transpose(y3.reshape(b, h, w, c), (0, 3, 1, 2))


if __name__ == "__main__":
    key = jax.random.PRNGKey(0)
    kx, kl, kw = jax.random.split(key, 3)

    B, C, H, W = 2, 32, 16, 16          # normalized dim = C = 32
    weight = 1.0 + 0.1 * jax.random.normal(kw, (C,), dtype=jnp.float32)

    # 1) Restormer path: NCHW in / NCHW out, no wrapper transposes.
    x_nchw = jax.random.normal(kx, (B, C, H, W), dtype=jnp.float32)
    y = jax.block_until_ready(biasfree_layernorm_nchw(x_nchw, weight))
    ref = _ref_nchw(x_nchw, weight)
    assert y.shape == x_nchw.shape and y.dtype == x_nchw.dtype
    assert jnp.allclose(y, ref, atol=2e-5, rtol=2e-5), "NCHW path mismatch"

    # 2) Literal module API: x of shape (b, h*w, c), normalize the last dim.
    x_last = jax.random.normal(kl, (B, H * W, C), dtype=jnp.float32)
    y_last = jax.block_until_ready(biasfree_layernorm(x_last, weight))
    ref_last = _ref_last_dim(x_last, weight)
    assert jnp.allclose(y_last, ref_last, atol=2e-5, rtol=2e-5), \
        "last-dim path mismatch"

    # 3) bf16 input: DMA moves bf16, compute stays f32 inside the kernel.
    x_bf16 = x_nchw.astype(jnp.bfloat16)
    y_bf16 = jax.block_until_ready(biasfree_layernorm_nchw(x_bf16, weight))
    assert y_bf16.dtype == jnp.bfloat16
    assert jnp.allclose(y_bf16.astype(jnp.float32),
                        _ref_nchw(x_bf16, weight).astype(jnp.float32),
                        atol=3e-2, rtol=3e-2), "bf16 path mismatch"

    print("KERNEL_OK")
</pallas_src>

<mosaic_0001>
module attributes {stable_mosaic.version = 11 : i64} {
  func.func @_biasfree_ln_kernel(%arg0: i32, %arg1: i32, %arg2: memref<1x32x128xf32, #tpu.memory_space<vmem>>, %arg3: memref<32x1xf32, #tpu.memory_space<vmem>>, %arg4: memref<1x32x128xf32, #tpu.memory_space<vmem>>) attributes {dimension_semantics = [#tpu.dimension_semantics<parallel>, #tpu.dimension_semantics<parallel>], iteration_bounds = array<i64: 2, 2>, scalar_prefetch = 0 : i64, scratch_operands = 0 : i64, tpu.core_type = #tpu.core_type<tc>, window_params = [{transform_indices = @transform_0, window_bounds = array<i64: 1, 32, 128>}, {pipeline_mode = #tpu.pipeline_mode<synchronous>, transform_indices = @transform_1, window_bounds = array<i64: 32, 1>}, {transform_indices = @transform_2, window_bounds = array<i64: 1, 32, 128>}]} {
    %c0 = arith.constant 0 : index
    %c0_0 = arith.constant 0 : index
    %c0_1 = arith.constant 0 : index
    %0 = vector.load %arg2[%c0, %c0_0, %c0_1] : memref<1x32x128xf32, #tpu.memory_space<vmem>>, vector<1x32x128xf32>
    %1 = vector.shape_cast %0 : vector<1x32x128xf32> to vector<32x128xf32>
    %c0_2 = arith.constant 0 : index
    %c0_3 = arith.constant 0 : index
    %2 = vector.load %arg3[%c0_2, %c0_3] : memref<32x1xf32, #tpu.memory_space<vmem>>, vector<32x1xf32>
    %cst = arith.constant dense<0.000000e+00> : vector<128xf32>
    %3 = vector.multi_reduction <add>, %1, %cst [0] : vector<32x128xf32> to vector<128xf32>
    %4 = vector.shape_cast %3 : vector<128xf32> to vector<1x128xf32>
    %5 = arith.mulf %1, %1 : vector<32x128xf32>
    %cst_4 = arith.constant dense<0.000000e+00> : vector<128xf32>
    %6 = vector.multi_reduction <add>, %5, %cst_4 [0] : vector<32x128xf32> to vector<128xf32>
    %7 = vector.shape_cast %6 : vector<128xf32> to vector<1x128xf32>
    %cst_5 = arith.constant 3.125000e-02 : f32
    %8 = vector.broadcast %cst_5 : f32 to vector<1x128xf32>
    %9 = arith.mulf %4, %8 : vector<1x128xf32>
    %cst_6 = arith.constant 3.125000e-02 : f32
    %10 = vector.broadcast %cst_6 : f32 to vector<1x128xf32>
    %11 = arith.mulf %7, %10 : vector<1x128xf32>
    %12 = arith.mulf %9, %9 : vector<1x128xf32>
    %13 = arith.subf %11, %12 : vector<1x128xf32>
    %cst_7 = arith.constant 9.99999974E-6 : f32
    %14 = vector.broadcast %cst_7 : f32 to vector<1x128xf32>
    %15 = arith.addf %13, %14 : vector<1x128xf32>
    %16 = math.rsqrt %15 : vector<1x128xf32>
    %17 = vector.broadcast %16 : vector<1x128xf32> to vector<32x128xf32>
    %18 = arith.mulf %1, %17 : vector<32x128xf32>
    %19 = vector.broadcast %2 : vector<32x1xf32> to vector<32x128xf32>
    %20 = arith.mulf %18, %19 : vector<32x128xf32>
    %c0_8 = arith.constant 0 : index
    %c0_9 = arith.constant 0 : index
    %c0_10 = arith.constant 0 : index
    %21 = vector.load %arg4[%c0_8, %c0_9, %c0_10] : memref<1x32x128xf32, #tpu.memory_space<vmem>>, vector<1x32x128xf32>
    %22 = vector.shape_cast %21 : vector<1x32x128xf32> to vector<32x128xf32>
    %23 = vector.shape_cast %20 : vector<32x128xf32> to vector<1x32x128xf32>
    tpu.vector_store %arg4[%c0_8, %c0_9, %c0_10], %23 {strides = array<i32>} : memref<1x32x128xf32, #tpu.memory_space<vmem>>, vector<1x32x128xf32>,
    return
  }
  func.func @transform_0(%arg0: i32, %arg1: i32) -> (i32, i32, i32) {
    %c0_i32 = arith.constant 0 : i32
    %c0_i32_0 = arith.constant 0 : i32
    return %arg0, %c0_i32, %arg1 : i32, i32, i32
  }
  func.func @transform_1(%arg0: i32, %arg1: i32) -> (i32, i32) {
    %c0_i32 = arith.constant 0 : i32
    %c0_i32_0 = arith.constant 0 : i32
    %c0_i32_1 = arith.constant 0 : i32
    return %c0_i32, %c0_i32_0 : i32, i32
  }
  func.func @transform_2(%arg0: i32, %arg1: i32) -> (i32, i32, i32) {
    %c0_i32 = arith.constant 0 : i32
    %c0_i32_0 = arith.constant 0 : i32
    return %arg0, %c0_i32, %arg1 : i32, i32, i32
  }
}

</mosaic_0001>

<bundles_post_ra>
// kernel: tpu_custom_call.1
= control target key start
LH: loop header
LB: loop body
LE: loop exit
PB: predicated region body
PF: predicated region fallthrough
CT: control target
= control target key end

     0   :  { %7 = vsyncpa [#allocation3], 0  ;;  %s777_s0 = inlined_call_operand.hbm [shape: f32[2,32,256], index: 0, kind: input, shape index: {}]   ;;  %s778_s1 = inlined_call_operand.vmem [shape: f32[32,1], index: 1, kind: input, shape index: {}]   ;;  %s779_s2 = inlined_call_operand.hbm [shape: f32[2,32,256], index: 2, kind: output, shape index: {}]  }
   0x1   :  { %9 = vsyncpa [#allocation3 + $0x1], 0 }
   0x2   :  { %10 = vsyncpa [#allocation4], 0 }
   0x3   :  { %12 = vsyncpa [#allocation4 + $0x1], 0  ;;  %s619_s9 = smov 0   ;;  %s621_s10 = smov 0  }
   0x4   :  { %s623_s11 = smov 0   ;;  %s625_s12 = smov 0  }
   0x5   :  { %s627_s13 = smov 0   ;;  %s629_s14 = smov 0  }
   0x6   :  { %s631_s15 = smov 0   ;;  %s633_s16 = smov 0  }
   0x7 LB: > { %s363_s17 = sadd.s32 4294967295, %s595_s16   ;;  %s364_s18 = sadd.s32 4294967294, %s595_s16   ;;  %s595_s16 = sphi %s633_s16, %s18_s16   ;;  %s591_s15 = sphi %s631_s15, %s796_s15   ;;  %s587_s14 = sphi %s629_s14, %s795_s14   ;;  %s583_s13 = sphi %s627_s13, %s794_s13   ;;  %s579_s12 = sphi %s625_s12, %s793_s12   ;;  %s575_s11 = sphi %s623_s11, %s792_s11   ;;  %s571_s10 = sphi %s621_s10, %s791_s10   ;;  %s567_s9 = sphi %s619_s9, %s790_s9  }
   0x8   : > { %s27_s19 = sadd.s32 1, %s587_s14  ;;  %s30_s20 = sadd.s32 1, %s591_s15 }
   0x9   : > { %p28_p0 = scmp.ge.s32.totalorder %s27_s19, 2  ;;  %s39_s21 = sadd.s32 1, %s575_s11 }
   0xa   : > { %p46_p1 = scmp.ne.s32.totalorder %s575_s11, %s571_s10  ;;  %p47_p2 = scmp.eq.s32.totalorder %s595_s16, 0 }
   0xb   : > { %s798_s19 = smov (%p28_p0, %s27_s19), 0  ;;  %s800_s20 = smov (!%p28_p0, %s30_s20), %s591_s15 }
   0xc   : > { %782 = sst [smem:[#allocation8_spill]] %s798_s19  ;;  %s35_s22 = ssub.s32 %s587_s14, %s798_s19 }
   0xd   : > { %p672_p3 = por %p47_p2, %p46_p1  ;;  %p32_p4 = scmp.ge.s32.totalorder %s800_s20, 2 }
   0xe   : > { %p52_p5 = scmp.ne.s32.totalorder %s571_s10, %s567_s9  ;;  %p53_p6 = scmp.eq.s32.totalorder %s363_s17, 0 }
   0xf   : > { %p99_p7 = scmp.eq.s32.totalorder %s363_s17, 3  ;;  %s802_s20 = smov (%p32_p4, %s800_s20), 0 }
  0x10   : > { %784 = sst [smem:[#allocation9_spill]] %s802_s20  ;;  %p680_p8 = por %p53_p6, %p52_p5 }
  0x11   : > { %p684_p9 = por %p99_p7, %p46_p1  ;;  %s34_s26 = ssub.s32 %s591_s15, %s802_s20 }
  0x12   : > { %p105_p10 = scmp.eq.s32.totalorder %s364_s18, 3  ;;  %s36_s27 = sor.u32 %s35_s22, %s34_s26 }
  0x13   : > { %p37_p11 = scmp.eq.s32.totalorder %s36_s27, 0  ;;  %p390_p13 = scmp.lt.s32.totalorder %s595_s16, 4 }
  0x14   : > { %p690_p12 = por %p105_p10, %p52_p5  ;;  %s128_s29 = sand.u32 1, %s575_s11  }
  0x15   : > { %s697_s30 = scalar_select %p37_p11, %s575_s11, %s39_s21  }
  0x16   : > { %s367_s3 = sshll.u32 %s128_s29, 5  ;;  %s368_s4 = sshll.u32 %s591_s15, 3 }
  0x17   : > { %s136_s5 = sadd.s32 %s587_s14, %s368_s4  ;;  %s132_s6 = scalar_lea.vmem [#allocation2], %s367_s3 }
  0x18   : > { %s141_s7 = sshll.u32 %s132_s6, 4  ;;  %s369_s8 = sshll.u32 %s136_s5, 3  ;;  %s142_s7 = int_to_ptr.vmem [resolvable:$true] %s141_s7 }
  0x19   : > { %s138_s22 = scalar_lea.hbm %s777_s0, %s369_s8  ;;  %p383_p0 = pnand %p390_p13, %p672_p3 }
  0x1a   : > { %s139_s26 = sshll.u32 %s138_s22, 4  ;;  %s129_s27 = scalar_lea.sflag [#allocation3], %s128_s29  ;;  %s140_s26 = int_to_ptr.hbm [resolvable:$true] %s139_s26 }
  0x1b   : > { %s597_s21 = smov 256   ;;  %s598_s20 = smov 128  }
  0x1c   : > { %s599_s19 = smov 8   ;;  %p370_p1 = scmp.ge.s32.totalorder %s595_s16, 1 }
  0x1d   : > { %385 = dma.hbm_to_vmem [thread:$0]  (!%p383_p0), %s140_s26, 512, %s142_s7, %s129_s27, %s597_s21, %s598_s20, %s599_s19  }
  0x1e   : > { %p149_p2 = scmp.lt.s32.totalorder %s595_s16, 5 }
  0x20   : > { %p150_p4 = pnand %p370_p1, %p149_p2 }
  0x21   : > { %s709_s3 = sand.u32 (!%p150_p4), 1, %s571_s10  }
  0x22   : > { %153 = sbr.rel (%p150_p4) target bundleno = 173 (0xad), region = 28  ;;  %s371_s23 = sshll.u32 (!%p150_p4), %s709_s3, 5 }
  0x23   : > { %s156_s4 = scalar_lea.sflag (!%p150_p4), [#allocation3], %s709_s3  ;;  %s159_s5 = scalar_lea.vmem (!%p150_p4), [#allocation2], %s371_s23 }
  0x27   : > { %558 = dma.done.wait (%p680_p8), %s156_s4, 512  }
  0x28   : > { %560 = vsyncadd (%p680_p8), %s156_s4, 4294966784  ;;  %v600_v0 = vmov 0   ;;  %v187_v1 = vld [vmem:[%s778_s1 + $0x10] sm:$0xff]  ;;  %v185_v2 = vld [vmem:[%s778_s1] sm:$0xff]  ;;  %s374_s18 = sshll.u32 %s583_s13, 3  ;;  %s180_s27 = scalar_lea.vmem [#allocation5], %s371_s23 }
  0x29   : > { %464 = vset.pattern.permute.xlu1 %v600_v0  ;;  %463 = vset.pattern.permute.xlu0 %v600_v0  ;;  %v188_v3 = vld [vmem:[%s778_s1 + $0x18] sm:$0xff]  ;;  %v186_v4 = vld [vmem:[%s778_s1 + $0x8] sm:$0xff]  ;;  %v181_v5 = vld [vmem:[%s159_s5] sm:$0xff]  ;;  %s269_s22 = sadd.s32 %s579_s12, %s374_s18  ;;  %s272_s19 = sshll.u32 %s180_s27, 4  ;;  %s273_s19 = int_to_ptr.vmem [resolvable:$true] %s272_s19 }
  0x2a   : > { %242 = vperm.xlu1 %464, %v187_v1   ;;  %232 = vperm.xlu0 %463, %v185_v2   ;;  %v182_v6 = vld [vmem:[%s159_s5 + $0x8] sm:$0xff]  ;;  %v198_v8 = vmul.f32 %v181_v5, %v181_v5  ;;  %v183_v10 = vld [vmem:[%s159_s5 + $0x10] sm:$0xff]  ;;  %v184_v14 = vld [vmem:[%s159_s5 + $0x18] sm:$0xff]  ;;  %s375_s26 = sshll.u32 %s269_s22, 3  ;;  %s259_s12 = scalar_lea.sflag [#allocation4], %s709_s3 }
  0x2b   : > { %v189_v7 = vadd.f32 %v182_v6, %v181_v5  ;;  %v199_v9 = vmul.f32 %v182_v6, %v182_v6  ;;  %v200_v12 = vmul.f32 %v183_v10, %v183_v10  ;;  %v201_v16 = vmul.f32 %v184_v14, %v184_v14  ;;  %s271_s5 = scalar_lea.hbm %s779_s2, %s375_s26  ;;  %s517_s7 = scalar_lea.hbm %s779_s2, 128 }
  0x2c   : > { %s274_s13 = sshll.u32 %s271_s5, 4  ;;  %s275_s13 = int_to_ptr.hbm [resolvable:$true] %s274_s13 }
  0x2d   : > { %v190_v11 = vadd.f32 %v189_v7, %v183_v10  ;;  %v202_v13 = vadd.f32 %v199_v9, %v198_v8  ;;  %s511_s23 = sshra.s32 %s275_s13, 4  ;;  %s512_s23 = int_to_ptr.hbm [resolvable:$true] %s511_s23 }
  0x2e   : > { %s513_s20 = scalar_lea.hbm %s512_s23, 32  ;;  %p518_p7 = scmp.lt.s32.totalorder %s512_s23, %s779_s2 }
  0x2f   : > { %v191_v15 = vadd.f32 %v190_v11, %v184_v14  ;;  %v203_v17 = vadd.f32 %v202_v13, %v200_v12  ;;  %p514_p3 = scmp.ne.s32.totalorder %s512_s23, %s513_s20  ;;  %p519_p8 = scmp.lt.s32.totalorder %s517_s7, %s513_s20 }
  0x31   : > { %v192_v18 = vrot.slane %v191_v15, 4  ;;  %v204_v19 = vadd.f32 %v203_v17, %v201_v16  ;;  %p515_p5 = pnand %p514_p3, %p684_p9  ;;  %p520_p10 = por %p519_p8, %p518_p7 }
  0x32   : > { %247 = vperm.xlu1 %464, %v188_v3   ;;  %237 = vperm.xlu0 %463, %v186_v4  }
  0x33   : > { %v193_v20 = vadd.f32 %v192_v18, %v191_v15  ;;  %v205_v21 = vrot.slane %v204_v19, 4  ;;  %p516_p6 = pneg %p515_p5 }
  0x35   : > { %v194_v22 = vrot.slane %v193_v20, 2  ;;  %v206_v23 = vadd.f32 %v205_v21, %v204_v19  ;;  %p521_p11 = pnand %p520_p10, %p516_p6 }
  0x37   : > { %v195_v24 = vadd.f32 %v194_v22, %v193_v20  ;;  %v207_v25 = vrot.slane %v206_v23, 2 }
  0x39   : > { %v196_v26 = vrot.slane %v195_v24, 1  ;;  %v208_v27 = vadd.f32 %v207_v25, %v206_v23 }
  0x3b   : > { %v197_v28 = vadd.f32 %v196_v26, %v195_v24  ;;  %v209_v29 = vrot.slane %v208_v27, 1 }
  0x3d   : > { %v210_v30 = vadd.f32 %v209_v29, %v208_v27  ;;  %v211_v31 = vmul.f32 0.03125, %v197_v28 }
  0x3f   : > { %v212_v32 = vmul.f32 0.03125, %v210_v30  ;;  %v213_v33 = vmul.f32 %v211_v31, %v211_v31 }
  0x41   : > { %v214_v34 = vsub.f32 %v212_v32, %v213_v33 }
  0x43   : > { %v215_v35 = vadd.f32 1e-05, %v214_v34 }
  0x45   : > { %465 = vrsqrt.f32 %v215_v35  ;;  %vm222_vm0 = vweird.f32 %v215_v35 }
  0x4b   : > { %v466_v36 = vpop.eup %465 }
  0x4c   : > { %v217_v37 = vmul.f32 %v466_v36, %v215_v35  ;;  %vm223_vm1 = vweird.f32 %v466_v36 }
  0x4d   : > { %vm224_vm2 = vmor %vm222_vm0, %vm223_vm1 }
  0x4e   : > { %v218_v38 = vmul.f32 %v466_v36, %v217_v37 }
  0x50   : > { %v219_v39 = vmul.f32 0.5, %v218_v38 }
  0x52   : > { %v220_v40 = vsub.f32 1.5, %v219_v39 }
  0x54   : > { %v221_v41 = vmul.f32 %v466_v36, %v220_v40 }
  0x56   : > { %v225_v42 = vsel %vm224_vm2, %v466_v36, %v221_v41 }
  0x57   : > { %v228_v43 = vmul.f32 %v225_v42, %v183_v10  ;;  %v226_v44 = vmul.f32 %v225_v42, %v181_v5  ;;  %v229_v49 = vmul.f32 %v225_v42, %v184_v14  ;;  %v227_v50 = vmul.f32 %v225_v42, %v182_v6 }
  0x9c   : > { %v243_v45 = vpop.permute.xlu1 %242  ;;  %v233_v46 = vpop.permute.xlu0 %232 }
  0x9d   : > { %v252_v47 = vmul.f32 %v243_v45, %v228_v43  ;;  %v250_v48 = vmul.f32 %v233_v46, %v226_v44 }
  0x9f   : > { %256 = vst [vmem:[%s180_s27 + $0x10] sm:$0xff] %v252_v47 }
  0xa0   : > { %254 = vst [vmem:[%s180_s27] sm:$0xff] %v250_v48 }
  0xa4   : > { %v248_v51 = vpop.permute.xlu1 %247  ;;  %v238_v52 = vpop.permute.xlu0 %237 }
  0xa5   : > { %v253_v53 = vmul.f32 %v248_v51, %v229_v49  ;;  %v251_v54 = vmul.f32 %v238_v52, %v227_v50 }
  0xa7   : > { %257 = vst [vmem:[%s180_s27 + $0x18] sm:$0xff] %v253_v53 }
  0xa8   : > { %255 = vst [vmem:[%s180_s27 + $0x8] sm:$0xff] %v251_v54 }
  0xa9   : > { %524 = shalt.err (!%p521_p11)
}
  0xaa   : > { %s601_s3 = smov 128   ;;  %s602_s24 = smov 256  }
  0xab   : > { %s603_s18 = smov 8  }
  0xac   : > { %380 = dma.vmem_to_hbm [thread:$0]  (%p684_p9), %s273_s19, 512, %s275_s13, %s259_s12, %s601_s3, %s602_s24, %s603_s18  }
  0xad PF: > { %p391_p13 = scmp.ge.s32.totalorder %s595_s16, 2  ;;  %s289_s22 = sand.u32 1, %s567_s9  }
  0xae   : > { %s290_s26 = scalar_lea.sflag [#allocation4], %s289_s22 }
  0xaf   : > { %p387_p0 = pnand %p391_p13, %p690_p12 }
  0xb1   : > { %p388_p1 = pneg %p387_p0 }
  0xb3   : > { %562 = dma.done.wait (%p388_p1), %s290_s26, 512  }
  0xb4   : > { %564 = vsyncadd (%p388_p1), %s290_s26, 4294966784  ;;  %s18_s16 = sadd.s32 1, %s595_s16   ;;  %s788_s25 = sld [smem:[#allocation8_spill]] }
  0xb5   : > { %p15_p2 = scmp.ge.s32.totalorder %s18_s16, 6   ;;  %s789_s27 = sld [smem:[#allocation9_spill]] }
  0xb6   : > { %s790_s9 = smov %s571_s10  ;;  %s791_s10 = smov %s575_s11 }
  0xb7   : > { %s792_s11 = smov %s697_s30  ;;  %s793_s12 = smov %s587_s14 }
  0xb8   : > { %s794_s13 = smov %s591_s15  ;;  %17 = sbr.rel (!%p15_p2) target bundleno = 7 (0x7), region = 73 }
  0xba   : > { %s795_s14 = smov %s788_s25 }
  0xbb   : > { %s796_s15 = smov %s789_s27 }
  0xbd   :  { %296 = vsyncpa [#allocation3], 1 }
  0xbe   :  { %298 = vsyncpa [#allocation3 + $0x1], 1 }
  0xbf   :  { %299 = vsyncpa [#allocation4], 1 }
  0xc0   :  { %301 = vsyncpa [#allocation4 + $0x1], 1 }

</bundles_post_ra>
